<compile_context>
chip_gen: v7x
topology: tpu7x:2x2x1
jax: 0.10.0
libtpu: 0.0.40
codegen_flags: <defaults>
</compile_context>

<pallas_src>
import functools

import jax
import jax.numpy as jnp
from jax.experimental import pallas as pl
from jax.experimental.pallas import tpu as pltpu

D_IN, D_HID, D_OUT = 10, 10, 5


def _toy_mlp_kernel(xt_ref, w1t_ref, b1_ref, w2t_ref, b2_ref, ot_ref):
    # xt: (10, TB), w1t: (10, 10), b1: (10, 1), w2t: (5, 10), b2: (5, 1), out: (5, TB)
    xt = xt_ref[...]
    h = jnp.dot(
        w1t_ref[...], xt,
        preferred_element_type=jnp.float32,
        precision=jax.lax.Precision.HIGHEST,
    ) + b1_ref[...]
    h = jnp.maximum(h, 0.0)  # ReLU on the VPU
    y = jnp.dot(
        w2t_ref[...], h,
        preferred_element_type=jnp.float32,
        precision=jax.lax.Precision.HIGHEST,
    ) + b2_ref[...]
    ot_ref[...] = y.astype(ot_ref.dtype)


def _xla_forward(x, w1, b1, w2, b2):
    h = jnp.maximum(
        jnp.dot(x, w1, precision=jax.lax.Precision.HIGHEST) + b1.reshape(1, -1), 0.0
    )
    return jnp.dot(h, w2, precision=jax.lax.Precision.HIGHEST) + b2.reshape(1, -1)


@functools.partial(jax.jit, static_argnames=("max_tile", "min_pallas_batch"))
def toy_model_forward(x, w1, b1, w2, b2, *, max_tile=8192, min_pallas_batch=2048):
    """x: (B, 10) f32; w1: (10,10) (in,out); b1: (1,10); w2: (10,5); b2: (1,5) -> (B, 5)."""
    B = x.shape[0]

    # Tiny batches: a fused XLA matmul beats a custom-call launch + pipeline prologue.
    if B < min_pallas_batch:
        return _xla_forward(x, w1, b1, w2, b2)

    # Lane-dense orientation: batch on the 128-lane axis. Pure layout plumbing.
    xt = x.T                    # (10, B)
    w1t = w1.T                  # (10, 10): computes (W1^T @ x^T)
    w2t = w2.T                  # (5, 10)
    b1c = b1.reshape(-1, 1)     # (10, 1)
    b2c = b2.reshape(-1, 1)     # (5, 1)

    # Tile: either the whole batch (block dim == full array dim is always legal),
    # or a 128-multiple tile with a masked ragged boundary block.
    if B <= max_tile:
        TB = B
    else:
        assert max_tile % 128 == 0, "max_tile must be a multiple of 128"
        TB = max_tile
    grid = (pl.cdiv(B, TB),)

    param_bytes = (D_IN * D_HID + D_HID + D_HID * D_OUT + D_OUT) * 4
    cost = pl.CostEstimate(
        flops=2 * B * D_IN * D_HID + 2 * B * D_HID * D_OUT,
        transcendentals=0,
        bytes_accessed=B * (D_IN + D_OUT) * 4 + param_bytes,
    )

    out_t = pl.pallas_call(
        _toy_mlp_kernel,
        out_shape=jax.ShapeDtypeStruct((D_OUT, B), jnp.float32),
        grid=grid,
        in_specs=[
            # Streamed activations: one lane-dense batch tile per step (double-buffered).
            pl.BlockSpec((D_IN, TB), lambda i: (0, i)),
            # Parameters: constant block index -> VMEM-resident across all tiles.
            pl.BlockSpec((D_IN, D_HID), lambda i: (0, 0)),
            pl.BlockSpec((D_HID, 1), lambda i: (0, 0)),
            pl.BlockSpec((D_OUT, D_HID), lambda i: (0, 0)),
            pl.BlockSpec((D_OUT, 1), lambda i: (0, 0)),
        ],
        out_specs=pl.BlockSpec((D_OUT, TB), lambda i: (0, i)),
        compiler_params=pltpu.CompilerParams(
            # Batch tiles are independent -> shard across TensorCores where supported.
            dimension_semantics=("parallel",),
            vmem_limit_bytes=32 * 1024 * 1024,
        ),
        cost_estimate=cost,
    )(xt, w1t, b1c, w2t, b2c)

    return out_t.T  # (B, 5)


def _reference_forward(x, w1, b1, w2, b2):
    h = jnp.maximum(
        jnp.dot(x, w1, precision=jax.lax.Precision.HIGHEST) + b1, 0.0
    )
    return jnp.dot(h, w2, precision=jax.lax.Precision.HIGHEST) + b2


if __name__ == "__main__":
    key = jax.random.PRNGKey(0)
    k_x, k_w1, k_b1, k_w2, k_b2 = jax.random.split(key, 5)

    # Deterministic parameter init (uniform like nn.Linear's default, bound = 1/sqrt(fan_in)).
    bound1 = 1.0 / (D_IN ** 0.5)
    bound2 = 1.0 / (D_HID ** 0.5)
    w1 = jax.random.uniform(k_w1, (D_IN, D_HID), jnp.float32, -bound1, bound1)
    b1 = jax.random.uniform(k_b1, (1, D_HID), jnp.float32, -bound1, bound1)
    w2 = jax.random.uniform(k_w2, (D_HID, D_OUT), jnp.float32, -bound2, bound2)
    b2 = jax.random.uniform(k_b2, (1, D_OUT), jnp.float32, -bound2, bound2)

    # 1) Small batch, Pallas path forced (single full-extent tile).
    B = 8
    x = jax.random.normal(k_x, (B, D_IN), jnp.float32)
    y = jax.block_until_ready(toy_model_forward(x, w1, b1, w2, b2, min_pallas_batch=0))
    y_ref = _reference_forward(x, w1, b1, w2, b2)
    assert y.shape == (B, D_OUT)
    assert jnp.allclose(y, y_ref, atol=1e-5, rtol=1e-5), "mismatch vs reference (small)"

    # 2) Same small batch through the default dispatch (pure-XLA fast path).
    y_fast = jax.block_until_ready(toy_model_forward(x, w1, b1, w2, b2))
    assert jnp.allclose(y_fast, y_ref, atol=1e-5, rtol=1e-5), "mismatch (fast path)"

    # 3) Multi-tile + ragged boundary block (1111 = 2*512 + 87), Pallas path.
    B_big = 1111
    x_big = jax.random.normal(k_x, (B_big, D_IN), jnp.float32)
    y_big = jax.block_until_ready(
        toy_model_forward(x_big, w1, b1, w2, b2, max_tile=512, min_pallas_batch=0)
    )
    y_big_ref = _reference_forward(x_big, w1, b1, w2, b2)
    assert y_big.shape == (B_big, D_OUT)
    assert jnp.allclose(y_big, y_big_ref, atol=1e-5, rtol=1e-5), "mismatch (tiled) vs reference"

    # 4) Default-config Pallas path (B >= min_pallas_batch), one large lane-dense tile.
    B_def = 4096
    x_def = jax.random.normal(k_x, (B_def, D_IN), jnp.float32)
    y_def = jax.block_until_ready(toy_model_forward(x_def, w1, b1, w2, b2))
    y_def_ref = _reference_forward(x_def, w1, b1, w2, b2)
    assert y_def.shape == (B_def, D_OUT)
    assert jnp.allclose(y_def, y_def_ref, atol=1e-5, rtol=1e-5), "mismatch (default) vs reference"

    print("KERNEL_OK")
</pallas_src>

<mosaic_0001>
module attributes {stable_mosaic.version = 11 : i64} {
  func.func @_toy_mlp_kernel(%arg0: i32, %arg1: memref<10x8xf32, #tpu.memory_space<vmem>>, %arg2: memref<10x10xf32, #tpu.memory_space<vmem>>, %arg3: memref<10x1xf32, #tpu.memory_space<vmem>>, %arg4: memref<5x10xf32, #tpu.memory_space<vmem>>, %arg5: memref<5x1xf32, #tpu.memory_space<vmem>>, %arg6: memref<5x8xf32, #tpu.memory_space<vmem>>) attributes {dimension_semantics = [#tpu.dimension_semantics<parallel>], iteration_bounds = array<i64: 1>, scalar_prefetch = 0 : i64, scratch_operands = 0 : i64, tpu.core_type = #tpu.core_type<tc>, window_params = [{transform_indices = @transform_0, window_bounds = array<i64: 10, 8>}, {pipeline_mode = #tpu.pipeline_mode<synchronous>, transform_indices = @transform_1, window_bounds = array<i64: 10, 10>}, {pipeline_mode = #tpu.pipeline_mode<synchronous>, transform_indices = @transform_2, window_bounds = array<i64: 10, 1>}, {pipeline_mode = #tpu.pipeline_mode<synchronous>, transform_indices = @transform_3, window_bounds = array<i64: 5, 10>}, {pipeline_mode = #tpu.pipeline_mode<synchronous>, transform_indices = @transform_4, window_bounds = array<i64: 5, 1>}, {transform_indices = @transform_5, window_bounds = array<i64: 5, 8>}]} {
    %c0 = arith.constant 0 : index
    %c0_0 = arith.constant 0 : index
    %0 = vector.load %arg1[%c0, %c0_0] : memref<10x8xf32, #tpu.memory_space<vmem>>, vector<10x8xf32>
    %c0_1 = arith.constant 0 : index
    %c0_2 = arith.constant 0 : index
    %1 = vector.load %arg2[%c0_1, %c0_2] : memref<10x10xf32, #tpu.memory_space<vmem>>, vector<10x10xf32>
    %cst = arith.constant dense<0.000000e+00> : vector<10x8xf32>
    %2 = tpu.matmul %1, %0, %cst {dimension_numbers = #tpu.dot_dimension_numbers<[1], [0], [0], [1], [0, 0, 1, 1], [], []>, precision = #tpu.contract_precision<fp32>} : vector<10x10xf32>, vector<10x8xf32>, vector<10x8xf32> -> vector<10x8xf32>
    %c0_3 = arith.constant 0 : index
    %c0_4 = arith.constant 0 : index
    %3 = vector.load %arg3[%c0_3, %c0_4] : memref<10x1xf32, #tpu.memory_space<vmem>>, vector<10x1xf32>
    %4 = vector.broadcast %3 : vector<10x1xf32> to vector<10x8xf32>
    %5 = arith.addf %2, %4 : vector<10x8xf32>
    %cst_5 = arith.constant 0.000000e+00 : f32
    %6 = vector.broadcast %cst_5 : f32 to vector<10x8xf32>
    %7 = arith.maximumf %5, %6 : vector<10x8xf32>
    %c0_6 = arith.constant 0 : index
    %c0_7 = arith.constant 0 : index
    %8 = vector.load %arg4[%c0_6, %c0_7] : memref<5x10xf32, #tpu.memory_space<vmem>>, vector<5x10xf32>
    %cst_8 = arith.constant dense<0.000000e+00> : vector<5x8xf32>
    %9 = tpu.matmul %8, %7, %cst_8 {dimension_numbers = #tpu.dot_dimension_numbers<[1], [0], [0], [1], [0, 0, 1, 1], [], []>, precision = #tpu.contract_precision<fp32>} : vector<5x10xf32>, vector<10x8xf32>, vector<5x8xf32> -> vector<5x8xf32>
    %c0_9 = arith.constant 0 : index
    %c0_10 = arith.constant 0 : index
    %10 = vector.load %arg5[%c0_9, %c0_10] : memref<5x1xf32, #tpu.memory_space<vmem>>, vector<5x1xf32>
    %11 = vector.broadcast %10 : vector<5x1xf32> to vector<5x8xf32>
    %12 = arith.addf %9, %11 : vector<5x8xf32>
    %c0_11 = arith.constant 0 : index
    %c0_12 = arith.constant 0 : index
    %13 = vector.load %arg6[%c0_11, %c0_12] : memref<5x8xf32, #tpu.memory_space<vmem>>, vector<5x8xf32>
    tpu.vector_store %arg6[%c0_11, %c0_12], %12 {strides = array<i32>} : memref<5x8xf32, #tpu.memory_space<vmem>>, vector<5x8xf32>,
    return
  }
  func.func @transform_0(%arg0: i32) -> (i32, i32) {
    %c0_i32 = arith.constant 0 : i32
    %c0_i32_0 = arith.constant 0 : i32
    return %c0_i32, %arg0 : i32, i32
  }
  func.func @transform_1(%arg0: i32) -> (i32, i32) {
    %c0_i32 = arith.constant 0 : i32
    %c0_i32_0 = arith.constant 0 : i32
    %c0_i32_1 = arith.constant 0 : i32
    return %c0_i32, %c0_i32_0 : i32, i32
  }
  func.func @transform_2(%arg0: i32) -> (i32, i32) {
    %c0_i32 = arith.constant 0 : i32
    %c0_i32_0 = arith.constant 0 : i32
    %c0_i32_1 = arith.constant 0 : i32
    return %c0_i32, %c0_i32_0 : i32, i32
  }
  func.func @transform_3(%arg0: i32) -> (i32, i32) {
    %c0_i32 = arith.constant 0 : i32
    %c0_i32_0 = arith.constant 0 : i32
    %c0_i32_1 = arith.constant 0 : i32
    return %c0_i32, %c0_i32_0 : i32, i32
  }
  func.func @transform_4(%arg0: i32) -> (i32, i32) {
    %c0_i32 = arith.constant 0 : i32
    %c0_i32_0 = arith.constant 0 : i32
    %c0_i32_1 = arith.constant 0 : i32
    return %c0_i32, %c0_i32_0 : i32, i32
  }
  func.func @transform_5(%arg0: i32) -> (i32, i32) {
    %c0_i32 = arith.constant 0 : i32
    %c0_i32_0 = arith.constant 0 : i32
    return %c0_i32, %arg0 : i32, i32
  }
}

</mosaic_0001>

<bundles_post_ra>
// kernel: toy_model_forward.1
= control target key start
LH: loop header
LB: loop body
LE: loop exit
PB: predicated region body
PF: predicated region fallthrough
CT: control target
= control target key end

     0   :  { %vm43_vm0 = vcmask 1041408   ;;  %vm36_vm1 = vcmask 80896   ;;  %v1226_v3 = vmov 0   ;;  %v1227_v34 = vmov 0.0|0.0   ;;  %s1298_s0 = inlined_call_operand.vmem [shape: f32[10,8], index: 0, kind: input, shape index: {}]   ;;  %s1299_s1 = inlined_call_operand.vmem [shape: f32[10,10], index: 1, kind: input, shape index: {}]   ;;  %s1300_s2 = inlined_call_operand.vmem [shape: f32[10,1], index: 2, kind: input, shape index: {}]   ;;  %s1301_s4 = inlined_call_operand.vmem [shape: f32[5,1], index: 4, kind: input, shape index: {}]   ;;  %s1302_s3 = inlined_call_operand.vmem [shape: f32[5,10], index: 3, kind: input, shape index: {}]   ;;  %s1303_s5 = inlined_call_operand.vmem [shape: f32[5,8], index: 5, kind: output, shape index: {}]  }
   0x1   :  { %v20_v0 = vld [vmem:[%s1298_s0] sm:$0xff]  ;;  %v21_v1 = vld [vmem:[%s1298_s0 + $0x8] sm:$0x3]  ;;  %1224 = vset.pattern.permute.xlu0 %v1226_v3  ;;  %1225 = vset.pattern.permute.xlu1 %v1226_v3  ;;  %vm1228_vm2 = vmmov 0   ;;  %v1229_v35 = vmov 0.0   ;;  %vm1023_vm3 = vcmask 61440  }
   0x2   :  { %v22_v2 = vld [vmem:[%s1299_s1] sm:$0xff]  ;;  %v45_v4 = vsel %vm43_vm0, %v21_v1, 0  ;;  %v48_v5 = vand.u32 4294901760, %v20_v0  ;;  %v23_v6 = vld [vmem:[%s1299_s1 + $0x8] sm:$0x3]  ;;  %1179 = vmatprep.subr.bf16.mxu1 %v1227_v34  ;;  %1117 = vmatprep.mubr.msk.f32.mxu1 %vm1228_vm2, %v1229_v35 }
   0x3   :  { %v38_v7 = vsel %vm36_vm1, %v22_v2, 0  ;;  %v51_v8 = vand.u32 4294901760, %v45_v4  ;;  %v41_v10 = vsel %vm36_vm1, %v23_v6, 0  ;;  %v25_v11 = vld [vmem:[%s1300_s2 + $0x8] sm:$0x3]  ;;  %v24_v17 = vld [vmem:[%s1300_s2] sm:$0xff] }
   0x4   :  { %v114_v9 = vand.u32 4294901760, %v38_v7  ;;  %v124_v12 = vand.u32 4294901760, %v41_v10  ;;  %v136_v13 = vsub.f32 %v20_v0, %v48_v5  ;;  %33 = vperm.xlu0 %1224, %v25_v11   ;;  %v552_v36 = vld [vmem:[%s1301_s4] sm:$0x1f] }
   0x5   :  { %v1155_v14 = vpack.c.bf16 %v51_v8, %v48_v5  ;;  %v143_v16 = vsub.f32 %v45_v4, %v51_v8  ;;  %555 = vperm.xlu1 %1225, %v552_v36   ;;  %v551_v37 = vld [vmem:[%s1302_s3] sm:$0x1f] }
   0x6   :  { %v115_v15 = vsub.f32 %v38_v7, %v114_v9  ;;  %v125_v18 = vsub.f32 %v41_v10, %v124_v12  ;;  %v137_v19 = vand.u32 4294901760, %v136_v13  ;;  %v559_v38 = vsel %vm36_vm1, %v551_v37, 0 }
   0x7   :  { %1156 = vmatprep.subr.bf16.mxu0 %v1155_v14  ;;  %v144_v21 = vand.u32 4294901760, %v143_v16  ;;  %v1163_v32 = vpack.c.bf16 %v143_v16, %v136_v13  ;;  %v631_v39 = vand.u32 4294901760, %v559_v38 }
   0x8   :  { %v116_v20 = vand.u32 4294901760, %v115_v15  ;;  %1158 = vmatpush3.bf16.msra.mxu0 %v1155_v14  ;;  %v126_v22 = vand.u32 4294901760, %v125_v18  ;;  %v138_v23 = vsub.f32 %v136_v13, %v137_v19  ;;  %28 = vperm.xlu0 %1224, %v24_v17  }
   0x9   :  { %v145_v25 = vsub.f32 %v143_v16, %v144_v21  ;;  %v1171_v33 = vpack.c.bf16 %v144_v21, %v137_v19  ;;  %v632_v41 = vsub.f32 %v559_v38, %v631_v39 }
   0xa   :  { %v117_v24 = vsub.f32 %v115_v15, %v116_v20  ;;  %v127_v26 = vsub.f32 %v125_v18, %v126_v22  ;;  %v139_v27 = vand.u32 4294901760, %v138_v23 }
   0xb   :  { %v146_v29 = vand.u32 4294901760, %v145_v25  ;;  %v633_v46 = vand.u32 4294901760, %v632_v41 }
   0xc   :  { %v118_v28 = vand.u32 4294901760, %v117_v24  ;;  %v128_v30 = vand.u32 4294901760, %v127_v26 }
   0xd   :  { %v1159_v31 = vpack.c.bf16 %v146_v29, %v139_v27  ;;  %v634_v51 = vsub.f32 %v632_v41, %v633_v46 }
   0xe   :  { %1075 = vmatprep.mubr.f32.mxu0 %v118_v28 }
   0xf   :  { %1076 = vmatmul.mubr.f32.vlgmr.msra.gmra.mrb[0].mxu0 %v128_v30  ;;  %1160 = vmatprep.subr.bf16.mxu0 %v1159_v31  ;;  %v635_v57 = vand.u32 4294901760, %v634_v51 }
  0x10   :  { %1082 = vmatprep.mubr.f32.mxu0 %v114_v9  ;;  %1162 = vmatpush3.bf16.msra.mxu0 %v1159_v31 }
  0x11   :  { %1164 = vmatprep.subr.bf16.mxu0 %v1163_v32 }
  0x17   :  { %1083 = vmatmul.mubr.f32.vlgmr.msra.gmra.mrb[0].mxu0 %v124_v12 }
  0x18   :  { %1166 = vmatpush3.bf16.msra.mxu0 %v1163_v32  ;;  %1089 = vmatprep.mubr.f32.mxu0 %v115_v15 }
  0x19   :  { %1168 = vmatprep.subr.bf16.mxu0 %v1155_v14 }
  0x1f   :  { %1090 = vmatmul.mubr.f32.vlgmr.msra.gmra.mrb[0].mxu0 %v125_v18 }
  0x20   :  { %1170 = vmatpush3.bf16.msra.mxu0 %v1155_v14  ;;  %1096 = vmatprep.mubr.f32.mxu0 %v116_v20 }
  0x21   :  { %1172 = vmatprep.subr.bf16.mxu0 %v1171_v33 }
  0x27   :  { %1097 = vmatmul.mubr.f32.vlgmr.msra.gmra.mrb[0].mxu0 %v126_v22 }
  0x28   :  { %1174 = vmatpush3.bf16.msra.mxu0 %v1171_v33  ;;  %1103 = vmatprep.mubr.f32.mxu0 %v114_v9 }
  0x29   :  { %1176 = vmatprep.subr.bf16.mxu0 %v1155_v14 }
  0x2f   :  { %1104 = vmatmul.mubr.f32.vlgmr.msra.gmra.mrb[0].mxu0 %v124_v12 }
  0x30   :  { %1178 = vmatpush3.bf16.msra.mxu0 %v1155_v14  ;;  %1110 = vmatprep.mubr.f32.mxu0 %v114_v9 }
  0x37   :  { %1111 = vmatmul.mubr.f32.vlgmr.msra.gmra.mrb[0].mxu0 %v124_v12 }
  0x83   :  { %v34_v40 = vpop.permute.xlu0 %33 }
  0x84   :  { %v556_v3 = vpop.permute.xlu1 %555 }
  0x87   :  { %v29_v43 = vpop.permute.xlu0 %28 }
 0x10a   :  { %v1112_v42 = vpop.f32.mrb[0].mxu0 }
 0x10b   :  { %v1197_v44 = vadd.f32 %v1112_v42, %v34_v40  ;;  %v539_v45 = vpop.f32.mrb[1].mxu0 }
 0x10c   :  { %v1198_v47 = vadd.f32 %v539_v45, %v29_v43 }
 0x10d   :  { %v550_v48 = vmax.f32 %v1197_v44, 0.0 }
 0x10e   :  { %v549_v49 = vmax.f32 %v1198_v47, 0.0 }
 0x10f   :  { %v562_v50 = vsel %vm43_vm0, %v550_v48, 0 }
 0x110   :  { %v568_v52 = vand.u32 4294901760, %v562_v50  ;;  %v565_v53 = vand.u32 4294901760, %v549_v49 }
 0x112   :  { %v650_v54 = vsub.f32 %v562_v50, %v568_v52  ;;  %v643_v55 = vsub.f32 %v549_v49, %v565_v53  ;;  %v1180_v56 = vpack.c.bf16 %v568_v52, %v565_v53 }
 0x114   :  { %v651_v58 = vand.u32 4294901760, %v650_v54  ;;  %v644_v59 = vand.u32 4294901760, %v643_v55  ;;  %1181 = vmatpush3.bf16.msra.mxu1 %v1180_v56  ;;  %v1186_v60 = vpack.c.bf16 %v650_v54, %v643_v55 }
 0x115   :  { %1182 = vmatprep.subr.bf16.mxu1 %v1227_v34 }
 0x116   :  { %v652_v61 = vsub.f32 %v650_v54, %v651_v58  ;;  %v645_v62 = vsub.f32 %v643_v55, %v644_v59  ;;  %v1192_v63 = vpack.c.bf16 %v651_v58, %v644_v59 }
 0x117   :  { %1118 = vmatmul.mubr.f32.vlgmr.msra.gmra.mrb[0].mxu1 %v635_v57 }
 0x118   :  { %v653_v0 = vand.u32 4294901760, %v652_v61  ;;  %v646_v1 = vand.u32 4294901760, %v645_v62  ;;  %1124 = vmatprep.mubr.msk.f32.mxu1 %vm1228_vm2, %v1229_v35 }
 0x11a   :  { %v1183_v2 = vpack.c.bf16 %v653_v0, %v646_v1 }
 0x11c   :  { %1184 = vmatpush3.bf16.msra.mxu1 %v1183_v2 }
 0x11d   :  { %1185 = vmatprep.subr.bf16.mxu1 %v1227_v34 }
 0x11f   :  { %1125 = vmatmul.mubr.f32.vlgmr.msra.gmra.mrb[0].mxu1 %v631_v39 }
 0x120   :  { %1187 = vmatpush3.bf16.msra.mxu1 %v1186_v60  ;;  %1131 = vmatprep.mubr.msk.f32.mxu1 %vm1228_vm2, %v1229_v35 }
 0x121   :  { %1188 = vmatprep.subr.bf16.mxu1 %v1227_v34 }
 0x127   :  { %1132 = vmatmul.mubr.f32.vlgmr.msra.gmra.mrb[0].mxu1 %v632_v41 }
 0x128   :  { %1190 = vmatpush3.bf16.msra.mxu1 %v1180_v56  ;;  %1138 = vmatprep.mubr.msk.f32.mxu1 %vm1228_vm2, %v1229_v35 }
 0x129   :  { %1191 = vmatprep.subr.bf16.mxu1 %v1227_v34 }
 0x12f   :  { %1139 = vmatmul.mubr.f32.vlgmr.msra.gmra.mrb[0].mxu1 %v633_v46 }
 0x130   :  { %1193 = vmatpush3.bf16.msra.mxu1 %v1192_v63  ;;  %1145 = vmatprep.mubr.msk.f32.mxu1 %vm1228_vm2, %v1229_v35 }
 0x131   :  { %1194 = vmatprep.subr.bf16.mxu1 %v1227_v34 }
 0x137   :  { %1146 = vmatmul.mubr.f32.vlgmr.msra.gmra.mrb[0].mxu1 %v631_v39 }
 0x138   :  { %1196 = vmatpush3.bf16.msra.mxu1 %v1180_v56  ;;  %1152 = vmatprep.mubr.msk.f32.mxu1 %vm1228_vm2, %v1229_v35 }
 0x13f   :  { %1153 = vmatmul.mubr.f32.vlgmr.msra.gmra.mrb[0].mxu1 %v631_v39 }
 0x212   :  { %v1019_v4 = vpop.f32.mrb[0].mxu1 }
 0x213   :  { %v1199_v5 = vadd.f32 %v1019_v4, %v556_v3  ;;  %v1154_v6 = vpop.f32.mrb[1].mxu1 }
 0x215   :  { %1024 = vst.msk [vmem:[%s1303_s5] sm:$0x1f] %vm1023_vm3, %v1199_v5 }

</bundles_post_ra>
